<compile_context>
chip_gen: v7x
topology: tpu7x:2x2x1
jax: 0.10.0
libtpu: 0.0.40
codegen_flags: <defaults>
</compile_context>

<pallas_src>
from functools import partial

import numpy as np
import jax
import jax.numpy as jnp
from jax.experimental import pallas as pl
from jax.experimental.pallas import tpu as pltpu


def _round_up(x, m):
    return ((x + m - 1) // m) * m


def _clstm_kernel(w_ref, b_ref, s0_ref, s1_ref, s2_ref, c_ref, h2_ref, c2_ref,
                  *, wp, c_hid):
    """Fused ConvLSTM gate kernel for one (batch, depth) output slice.

    w_ref  : (27, 4C, cin_tot) bf16  per-tap gate weights, rows gate-major [i, f, o, g]
    b_ref  : (4C, 1)           f32   fused gate bias
    s*_ref : (cin_tot, PL)     bf16  padded input plane at depth d+kd (flattened (H+2)*(W+2))
    c_ref  : (C, TM)           f32   previous cell state tile
    h2_ref : (C, TM)           f32   new hidden state tile (output)
    c2_ref : (C, TM)           f32   new cell state tile (output)
    """
    C = c_hid
    TM = c_ref.shape[1]

    # Accumulate the 27 tap GEMMs (bf16 operands, f32 accumulation), bias pre-folded.
    g = jnp.broadcast_to(b_ref[...], (4 * C, TM)).astype(jnp.float32)
    slabs = (s0_ref, s1_ref, s2_ref)
    for kd in range(3):
        plane = slabs[kd][...]                       # (cin_tot, PL) bf16, one load per kd
        for kh in range(3):
            for kw in range(3):
                off = kh * wp + kw                   # static lane shift of the flat plane
                tap = plane[:, off:off + TM]         # (cin_tot, TM)
                t = kd * 9 + kh * 3 + kw
                g = g + jnp.dot(w_ref[t], tap, preferred_element_type=jnp.float32)

    # Gate nonlinearities + cell update on lane-dense (C, TM) f32 tiles.
    def sig(v):                                      # sigmoid via tanh: single EUP push
        return 0.5 * jnp.tanh(0.5 * v) + 0.5

    i_g = sig(g[0 * C:1 * C, :])
    f_g = sig(g[1 * C:2 * C, :])
    o_g = sig(g[2 * C:3 * C, :])
    g_g = jnp.tanh(g[3 * C:4 * C, :])

    c2 = f_g * c_ref[...] + i_g * g_g
    h2_ref[...] = (o_g * jnp.tanh(c2)).astype(h2_ref.dtype)
    c2_ref[...] = c2


def clstm_cell_3d(x, h, c, w, b):
    """ConvLSTM-3D cell forward.

    x : (N, D, H, W, c_in)    float32
    h : (N, D, H, W, c_hid)   float32
    c : (N, D, H, W, c_hid)   float32
    w : (4, 3, 3, 3, c_in + c_hid, c_hid)  gate order [i, f, o, g]
    b : (4, c_hid)
    returns (h2, c2), each (N, D, H, W, c_hid)
    """
    N, D, H, W, c_in = x.shape
    c_hid = h.shape[-1]
    cin_tot = c_in + c_hid
    Dp, Hp, Wp = D + 2, H + 2, W + 2

    # Output lanes per (n, d) step: flat (y, x_padded) positions, rounded up to 128 lanes.
    TM = _round_up(H * Wp, 128)
    # Plane length must cover the largest tap shift (2*Wp + 2) past the last output lane.
    PL = _round_up(TM + 2 * Wp + 2, 128)

    # ---- glue (pure JAX, one pass over 1x data) ----
    # Padded, channel-major slab: (N, Dp, cin_tot, Hp*Wp -> PL), bf16.
    xh = jnp.concatenate([x, h], axis=-1)                            # (N, D, H, W, cin_tot)
    xp = jnp.pad(xh, ((0, 0), (1, 1), (1, 1), (1, 1), (0, 0)))       # "same" padding
    slab = jnp.moveaxis(xp, -1, 2).reshape(N, Dp, cin_tot, Hp * Wp)
    slab = jnp.pad(slab, ((0, 0), (0, 0), (0, 0), (0, PL - Hp * Wp))).astype(jnp.bfloat16)

    # Per-tap fused gate weights (27, 4C, cin_tot), rows gate-major [i, f, o, g]; bias (4C, 1).
    w_k = jnp.transpose(w, (1, 2, 3, 0, 5, 4)).reshape(27, 4 * c_hid, cin_tot)
    w_k = w_k.astype(jnp.bfloat16)
    b_k = b.reshape(4 * c_hid, 1).astype(jnp.float32)

    # Previous cell state in the same flattened padded-width lane layout: (N, D, C, TM).
    c_p = jnp.pad(c, ((0, 0), (0, 0), (0, 0), (0, Wp - W), (0, 0)))  # (N, D, H, Wp, C)
    c_t = jnp.moveaxis(c_p, -1, 2).reshape(N, D, c_hid, H * Wp)
    c_t = jnp.pad(c_t, ((0, 0), (0, 0), (0, 0), (0, TM - H * Wp))).astype(jnp.float32)

    # ---- BlockSpecs ----
    def slab_spec(kd):
        return pl.BlockSpec((None, None, cin_tot, PL),
                            lambda n, d, kd=kd: (n, d + kd, 0, 0))

    def state_spec():
        return pl.BlockSpec((None, None, c_hid, TM), lambda n, d: (n, d, 0, 0))

    # ---- VMEM budget: double-buffered per-step blocks + resident weights ----
    step_bytes = (3 * cin_tot * PL * 2          # three depth-tap planes (bf16)
                  + 3 * c_hid * TM * 4)         # c_prev + h2 + c2 tiles (f32)
    resident_bytes = 27 * 4 * c_hid * cin_tot * 2 + 4 * c_hid * 4
    vmem_limit = max(32 << 20, min(96 << 20, 4 * step_bytes + resident_bytes + (8 << 20)))
    try:  # cap below the physical VMEM of this generation (v7x: 64 MiB)
        cap = int(pltpu.get_tpu_info().vmem_capacity_bytes)
        vmem_limit = min(vmem_limit, max(16 << 20, int(0.75 * cap)))
    except Exception:
        pass

    kernel = partial(_clstm_kernel, wp=Wp, c_hid=c_hid)

    # ---- hot path: fused Pallas kernel (in-kernel taps + GEMMs + gates + cell update) ----
    h2_t, c2_t = pl.pallas_call(
        kernel,
        grid=(N, D),
        in_specs=[
            pl.BlockSpec((27, 4 * c_hid, cin_tot), lambda n, d: (0, 0, 0)),  # weights: resident
            pl.BlockSpec((4 * c_hid, 1), lambda n, d: (0, 0)),               # bias: resident
            slab_spec(0), slab_spec(1), slab_spec(2),                        # depth taps d, d+1, d+2
            state_spec(),                                                    # c_prev tile
        ],
        out_specs=(state_spec(), state_spec()),
        out_shape=(
            jax.ShapeDtypeStruct((N, D, c_hid, TM), jnp.float32),
            jax.ShapeDtypeStruct((N, D, c_hid, TM), jnp.float32),
        ),
        compiler_params=pltpu.CompilerParams(
            dimension_semantics=("parallel", "parallel"),   # independent (n, d) steps
            vmem_limit_bytes=int(vmem_limit),
        ),
    )(w_k, b_k, slab, slab, slab, c_t)

    def back(y):
        y = y[..., :H * Wp].reshape(N, D, c_hid, H, Wp)[..., :W]
        return jnp.moveaxis(y, 2, -1)

    return back(h2_t), back(c2_t)


def clstm_cell_3d_ref(x, h, c, w, b):
    """Pure-JAX reference (matches the PyTorch forward semantics)."""
    c_hid = h.shape[-1]
    cin_tot = x.shape[-1] + c_hid
    xh = jnp.concatenate([x, h], axis=-1)
    # (4, kd, kh, kw, cin, C) -> DHWIO with output channel = gate-major, hid-minor
    w_dhwio = jnp.transpose(w, (1, 2, 3, 4, 0, 5)).reshape(3, 3, 3, cin_tot, 4 * c_hid)
    b_flat = b.reshape(4 * c_hid)
    g = jax.lax.conv_general_dilated(
        xh, w_dhwio, window_strides=(1, 1, 1), padding="SAME",
        dimension_numbers=("NDHWC", "DHWIO", "NDHWC"),
        precision=jax.lax.Precision.HIGHEST) + b_flat
    i, f, o, gg = (g[..., 0 * c_hid:1 * c_hid], g[..., 1 * c_hid:2 * c_hid],
                   g[..., 2 * c_hid:3 * c_hid], g[..., 3 * c_hid:4 * c_hid])
    i, f, o = jax.nn.sigmoid(i), jax.nn.sigmoid(f), jax.nn.sigmoid(o)
    gg = jnp.tanh(gg)
    c2 = f * c + i * gg
    h2 = o * jnp.tanh(c2)
    return h2, c2


if __name__ == "__main__":
    # Small shapes consistent with the module (NCDHW equivalent: x = [2, 4, 4, 8, 8]).
    N, c_in, c_hid, D, H, W = 2, 4, 8, 4, 8, 8

    key = jax.random.PRNGKey(0)
    k1, k2, k3, k4, k5 = jax.random.split(key, 5)
    x = jax.random.normal(k1, (N, D, H, W, c_in), jnp.float32)
    h = jax.random.normal(k2, (N, D, H, W, c_hid), jnp.float32)
    c = jax.random.normal(k3, (N, D, H, W, c_hid), jnp.float32)
    # Deterministic synthetic parameters (shapes per nn.Conv3d(c_in+c_hid, 4*c_hid, 3, padding=1)).
    w = jax.random.normal(k4, (4, 3, 3, 3, c_in + c_hid, c_hid), jnp.float32) * 0.05
    b = jax.random.normal(k5, (4, c_hid), jnp.float32) * 0.05

    fwd = jax.jit(clstm_cell_3d)
    h2, c2 = fwd(x, h, c, w, b)
    jax.block_until_ready((h2, c2))

    h2_ref, c2_ref = clstm_cell_3d_ref(x, h, c, w, b)
    np.testing.assert_allclose(np.asarray(h2), np.asarray(h2_ref), rtol=2e-2, atol=2e-2)
    np.testing.assert_allclose(np.asarray(c2), np.asarray(c2_ref), rtol=2e-2, atol=2e-2)

    print("KERNEL_OK")
</pallas_src>

<mosaic_0001>
module attributes {stable_mosaic.version = 11 : i64} {
  func.func @_clstm_kernel(%arg0: i32, %arg1: i32, %arg2: memref<27x32x12xbf16, #tpu.memory_space<vmem>>, %arg3: memref<32x1xf32, #tpu.memory_space<vmem>>, %arg4: memref<1x1x12x256xbf16, #tpu.memory_space<vmem>>, %arg5: memref<1x1x12x256xbf16, #tpu.memory_space<vmem>>, %arg6: memref<1x1x12x256xbf16, #tpu.memory_space<vmem>>, %arg7: memref<1x1x8x128xf32, #tpu.memory_space<vmem>>, %arg8: memref<1x1x8x128xf32, #tpu.memory_space<vmem>>, %arg9: memref<1x1x8x128xf32, #tpu.memory_space<vmem>>) attributes {dimension_semantics = [#tpu.dimension_semantics<parallel>, #tpu.dimension_semantics<parallel>], iteration_bounds = array<i64: 2, 4>, scalar_prefetch = 0 : i64, scratch_operands = 0 : i64, tpu.core_type = #tpu.core_type<tc>, window_params = [{pipeline_mode = #tpu.pipeline_mode<synchronous>, transform_indices = @transform_0, window_bounds = array<i64: 27, 32, 12>}, {pipeline_mode = #tpu.pipeline_mode<synchronous>, transform_indices = @transform_1, window_bounds = array<i64: 32, 1>}, {transform_indices = @transform_2, window_bounds = array<i64: 1, 1, 12, 256>}, {transform_indices = @transform_3, window_bounds = array<i64: 1, 1, 12, 256>}, {transform_indices = @transform_4, window_bounds = array<i64: 1, 1, 12, 256>}, {transform_indices = @transform_5, window_bounds = array<i64: 1, 1, 8, 128>}, {transform_indices = @transform_6, window_bounds = array<i64: 1, 1, 8, 128>}, {transform_indices = @transform_7, window_bounds = array<i64: 1, 1, 8, 128>}]} {
    %c0 = arith.constant 0 : index
    %c0_0 = arith.constant 0 : index
    %0 = vector.load %arg3[%c0, %c0_0] : memref<32x1xf32, #tpu.memory_space<vmem>>, vector<32x1xf32>
    %1 = vector.shape_cast %0 : vector<32x1xf32> to vector<32x1xf32>
    %2 = vector.broadcast %1 : vector<32x1xf32> to vector<32x128xf32>
    %c0_1 = arith.constant 0 : index
    %c0_2 = arith.constant 0 : index
    %c0_3 = arith.constant 0 : index
    %c0_4 = arith.constant 0 : index
    %3 = vector.load %arg4[%c0_1, %c0_2, %c0_3, %c0_4] : memref<1x1x12x256xbf16, #tpu.memory_space<vmem>>, vector<1x1x12x256xbf16>
    %4 = vector.shape_cast %3 : vector<1x1x12x256xbf16> to vector<12x256xbf16>
    %5 = vector.extract_strided_slice %4 {offsets = [0, 0], sizes = [12, 128], strides = [1, 1]} : vector<12x256xbf16> to vector<12x128xbf16>
    %c0_5 = arith.constant 0 : index
    %c0_6 = arith.constant 0 : index
    %c0_7 = arith.constant 0 : index
    %6 = vector.load %arg2[%c0_5, %c0_6, %c0_7] : memref<27x32x12xbf16, #tpu.memory_space<vmem>>, vector<1x32x12xbf16>
    %7 = vector.shape_cast %6 : vector<1x32x12xbf16> to vector<32x12xbf16>
    %cst = arith.constant dense<0.000000e+00> : vector<32x128xf32>
    %8 = tpu.matmul %7, %5, %cst {dimension_numbers = #tpu.dot_dimension_numbers<[1], [0], [0], [1], [0, 0, 1, 1], [], []>} : vector<32x12xbf16>, vector<12x128xbf16>, vector<32x128xf32> -> vector<32x128xf32>
    %9 = arith.addf %2, %8 : vector<32x128xf32>
    %10 = vector.extract_strided_slice %4 {offsets = [0, 1], sizes = [12, 128], strides = [1, 1]} : vector<12x256xbf16> to vector<12x128xbf16>
    %c1 = arith.constant 1 : index
    %c0_8 = arith.constant 0 : index
    %c0_9 = arith.constant 0 : index
    %11 = vector.load %arg2[%c1, %c0_8, %c0_9] : memref<27x32x12xbf16, #tpu.memory_space<vmem>>, vector<1x32x12xbf16>
    %12 = vector.shape_cast %11 : vector<1x32x12xbf16> to vector<32x12xbf16>
    %cst_10 = arith.constant dense<0.000000e+00> : vector<32x128xf32>
    %13 = tpu.matmul %12, %10, %cst_10 {dimension_numbers = #tpu.dot_dimension_numbers<[1], [0], [0], [1], [0, 0, 1, 1], [], []>} : vector<32x12xbf16>, vector<12x128xbf16>, vector<32x128xf32> -> vector<32x128xf32>
    %14 = arith.addf %9, %13 : vector<32x128xf32>
    %15 = vector.extract_strided_slice %4 {offsets = [0, 2], sizes = [12, 128], strides = [1, 1]} : vector<12x256xbf16> to vector<12x128xbf16>
    %c2 = arith.constant 2 : index
    %c0_11 = arith.constant 0 : index
    %c0_12 = arith.constant 0 : index
    %16 = vector.load %arg2[%c2, %c0_11, %c0_12] : memref<27x32x12xbf16, #tpu.memory_space<vmem>>, vector<1x32x12xbf16>
    %17 = vector.shape_cast %16 : vector<1x32x12xbf16> to vector<32x12xbf16>
    %cst_13 = arith.constant dense<0.000000e+00> : vector<32x128xf32>
    %18 = tpu.matmul %17, %15, %cst_13 {dimension_numbers = #tpu.dot_dimension_numbers<[1], [0], [0], [1], [0, 0, 1, 1], [], []>} : vector<32x12xbf16>, vector<12x128xbf16>, vector<32x128xf32> -> vector<32x128xf32>
    %19 = arith.addf %14, %18 : vector<32x128xf32>
    %20 = vector.extract_strided_slice %4 {offsets = [0, 10], sizes = [12, 128], strides = [1, 1]} : vector<12x256xbf16> to vector<12x128xbf16>
    %c3 = arith.constant 3 : index
    %c0_14 = arith.constant 0 : index
    %c0_15 = arith.constant 0 : index
    %21 = vector.load %arg2[%c3, %c0_14, %c0_15] : memref<27x32x12xbf16, #tpu.memory_space<vmem>>, vector<1x32x12xbf16>
    %22 = vector.shape_cast %21 : vector<1x32x12xbf16> to vector<32x12xbf16>
    %cst_16 = arith.constant dense<0.000000e+00> : vector<32x128xf32>
    %23 = tpu.matmul %22, %20, %cst_16 {dimension_numbers = #tpu.dot_dimension_numbers<[1], [0], [0], [1], [0, 0, 1, 1], [], []>} : vector<32x12xbf16>, vector<12x128xbf16>, vector<32x128xf32> -> vector<32x128xf32>
    %24 = arith.addf %19, %23 : vector<32x128xf32>
    %25 = vector.extract_strided_slice %4 {offsets = [0, 11], sizes = [12, 128], strides = [1, 1]} : vector<12x256xbf16> to vector<12x128xbf16>
    %c4 = arith.constant 4 : index
    %c0_17 = arith.constant 0 : index
    %c0_18 = arith.constant 0 : index
    %26 = vector.load %arg2[%c4, %c0_17, %c0_18] : memref<27x32x12xbf16, #tpu.memory_space<vmem>>, vector<1x32x12xbf16>
    %27 = vector.shape_cast %26 : vector<1x32x12xbf16> to vector<32x12xbf16>
    %cst_19 = arith.constant dense<0.000000e+00> : vector<32x128xf32>
    %28 = tpu.matmul %27, %25, %cst_19 {dimension_numbers = #tpu.dot_dimension_numbers<[1], [0], [0], [1], [0, 0, 1, 1], [], []>} : vector<32x12xbf16>, vector<12x128xbf16>, vector<32x128xf32> -> vector<32x128xf32>
    %29 = arith.addf %24, %28 : vector<32x128xf32>
    %30 = vector.extract_strided_slice %4 {offsets = [0, 12], sizes = [12, 128], strides = [1, 1]} : vector<12x256xbf16> to vector<12x128xbf16>
    %c5 = arith.constant 5 : index
    %c0_20 = arith.constant 0 : index
    %c0_21 = arith.constant 0 : index
    %31 = vector.load %arg2[%c5, %c0_20, %c0_21] : memref<27x32x12xbf16, #tpu.memory_space<vmem>>, vector<1x32x12xbf16>
    %32 = vector.shape_cast %31 : vector<1x32x12xbf16> to vector<32x12xbf16>
    %cst_22 = arith.constant dense<0.000000e+00> : vector<32x128xf32>
    %33 = tpu.matmul %32, %30, %cst_22 {dimension_numbers = #tpu.dot_dimension_numbers<[1], [0], [0], [1], [0, 0, 1, 1], [], []>} : vector<32x12xbf16>, vector<12x128xbf16>, vector<32x128xf32> -> vector<32x128xf32>
    %34 = arith.addf %29, %33 : vector<32x128xf32>
    %35 = vector.extract_strided_slice %4 {offsets = [0, 20], sizes = [12, 128], strides = [1, 1]} : vector<12x256xbf16> to vector<12x128xbf16>
    %c6 = arith.constant 6 : index
    %c0_23 = arith.constant 0 : index
    %c0_24 = arith.constant 0 : index
    %36 = vector.load %arg2[%c6, %c0_23, %c0_24] : memref<27x32x12xbf16, #tpu.memory_space<vmem>>, vector<1x32x12xbf16>
    %37 = vector.shape_cast %36 : vector<1x32x12xbf16> to vector<32x12xbf16>
    %cst_25 = arith.constant dense<0.000000e+00> : vector<32x128xf32>
    %38 = tpu.matmul %37, %35, %cst_25 {dimension_numbers = #tpu.dot_dimension_numbers<[1], [0], [0], [1], [0, 0, 1, 1], [], []>} : vector<32x12xbf16>, vector<12x128xbf16>, vector<32x128xf32> -> vector<32x128xf32>
    %39 = arith.addf %34, %38 : vector<32x128xf32>
    %40 = vector.extract_strided_slice %4 {offsets = [0, 21], sizes = [12, 128], strides = [1, 1]} : vector<12x256xbf16> to vector<12x128xbf16>
    %c7 = arith.constant 7 : index
    %c0_26 = arith.constant 0 : index
    %c0_27 = arith.constant 0 : index
    %41 = vector.load %arg2[%c7, %c0_26, %c0_27] : memref<27x32x12xbf16, #tpu.memory_space<vmem>>, vector<1x32x12xbf16>
    %42 = vector.shape_cast %41 : vector<1x32x12xbf16> to vector<32x12xbf16>
    %cst_28 = arith.constant dense<0.000000e+00> : vector<32x128xf32>
    %43 = tpu.matmul %42, %40, %cst_28 {dimension_numbers = #tpu.dot_dimension_numbers<[1], [0], [0], [1], [0, 0, 1, 1], [], []>} : vector<32x12xbf16>, vector<12x128xbf16>, vector<32x128xf32> -> vector<32x128xf32>
    %44 = arith.addf %39, %43 : vector<32x128xf32>
    %45 = vector.extract_strided_slice %4 {offsets = [0, 22], sizes = [12, 128], strides = [1, 1]} : vector<12x256xbf16> to vector<12x128xbf16>
    %c8 = arith.constant 8 : index
    %c0_29 = arith.constant 0 : index
    %c0_30 = arith.constant 0 : index
    %46 = vector.load %arg2[%c8, %c0_29, %c0_30] : memref<27x32x12xbf16, #tpu.memory_space<vmem>>, vector<1x32x12xbf16>
    %47 = vector.shape_cast %46 : vector<1x32x12xbf16> to vector<32x12xbf16>
    %cst_31 = arith.constant dense<0.000000e+00> : vector<32x128xf32>
    %48 = tpu.matmul %47, %45, %cst_31 {dimension_numbers = #tpu.dot_dimension_numbers<[1], [0], [0], [1], [0, 0, 1, 1], [], []>} : vector<32x12xbf16>, vector<12x128xbf16>, vector<32x128xf32> -> vector<32x128xf32>
    %49 = arith.addf %44, %48 : vector<32x128xf32>
    %c0_32 = arith.constant 0 : index
    %c0_33 = arith.constant 0 : index
    %c0_34 = arith.constant 0 : index
    %c0_35 = arith.constant 0 : index
    %50 = vector.load %arg5[%c0_32, %c0_33, %c0_34, %c0_35] : memref<1x1x12x256xbf16, #tpu.memory_space<vmem>>, vector<1x1x12x256xbf16>
    %51 = vector.shape_cast %50 : vector<1x1x12x256xbf16> to vector<12x256xbf16>
    %52 = vector.extract_strided_slice %51 {offsets = [0, 0], sizes = [12, 128], strides = [1, 1]} : vector<12x256xbf16> to vector<12x128xbf16>
    %c9 = arith.constant 9 : index
    %c0_36 = arith.constant 0 : index
    %c0_37 = arith.constant 0 : index
    %53 = vector.load %arg2[%c9, %c0_36, %c0_37] : memref<27x32x12xbf16, #tpu.memory_space<vmem>>, vector<1x32x12xbf16>
    %54 = vector.shape_cast %53 : vector<1x32x12xbf16> to vector<32x12xbf16>
    %cst_38 = arith.constant dense<0.000000e+00> : vector<32x128xf32>
    %55 = tpu.matmul %54, %52, %cst_38 {dimension_numbers = #tpu.dot_dimension_numbers<[1], [0], [0], [1], [0, 0, 1, 1], [], []>} : vector<32x12xbf16>, vector<12x128xbf16>, vector<32x128xf32> -> vector<32x128xf32>
    %56 = arith.addf %49, %55 : vector<32x128xf32>
    %57 = vector.extract_strided_slice %51 {offsets = [0, 1], sizes = [12, 128], strides = [1, 1]} : vector<12x256xbf16> to vector<12x128xbf16>
    %c10 = arith.constant 10 : index
    %c0_39 = arith.constant 0 : index
    %c0_40 = arith.constant 0 : index
    %58 = vector.load %arg2[%c10, %c0_39, %c0_40] : memref<27x32x12xbf16, #tpu.memory_space<vmem>>, vector<1x32x12xbf16>
    %59 = vector.shape_cast %58 : vector<1x32x12xbf16> to vector<32x12xbf16>
    %cst_41 = arith.constant dense<0.000000e+00> : vector<32x128xf32>
    %60 = tpu.matmul %59, %57, %cst_41 {dimension_numbers = #tpu.dot_dimension_numbers<[1], [0], [0], [1], [0, 0, 1, 1], [], []>} : vector<32x12xbf16>, vector<12x128xbf16>, vector<32x128xf32> -> vector<32x128xf32>
    %61 = arith.addf %56, %60 : vector<32x128xf32>
    %62 = vector.extract_strided_slice %51 {offsets = [0, 2], sizes = [12, 128], strides = [1, 1]} : vector<12x256xbf16> to vector<12x128xbf16>
    %c11 = arith.constant 11 : index
    %c0_42 = arith.constant 0 : index
    %c0_43 = arith.constant 0 : index
    %63 = vector.load %arg2[%c11, %c0_42, %c0_43] : memref<27x32x12xbf16, #tpu.memory_space<vmem>>, vector<1x32x12xbf16>
    %64 = vector.shape_cast %63 : vector<1x32x12xbf16> to vector<32x12xbf16>
    %cst_44 = arith.constant dense<0.000000e+00> : vector<32x128xf32>
    %65 = tpu.matmul %64, %62, %cst_44 {dimension_numbers = #tpu.dot_dimension_numbers<[1], [0], [0], [1], [0, 0, 1, 1], [], []>} : vector<32x12xbf16>, vector<12x128xbf16>, vector<32x128xf32> -> vector<32x128xf32>
    %66 = arith.addf %61, %65 : vector<32x128xf32>
    %67 = vector.extract_strided_slice %51 {offsets = [0, 10], sizes = [12, 128], strides = [1, 1]} : vector<12x256xbf16> to vector<12x128xbf16>
    %c12 = arith.constant 12 : index
    %c0_45 = arith.constant 0 : index
    %c0_46 = arith.constant 0 : index
    %68 = vector.load %arg2[%c12, %c0_45, %c0_46] : memref<27x32x12xbf16, #tpu.memory_space<vmem>>, vector<1x32x12xbf16>
    %69 = vector.shape_cast %68 : vector<1x32x12xbf16> to vector<32x12xbf16>
    %cst_47 = arith.constant dense<0.000000e+00> : vector<32x128xf32>
    %70 = tpu.matmul %69, %67, %cst_47 {dimension_numbers = #tpu.dot_dimension_numbers<[1], [0], [0], [1], [0, 0, 1, 1], [], []>} : vector<32x12xbf16>, vector<12x128xbf16>, vector<32x128xf32> -> vector<32x128xf32>
    %71 = arith.addf %66, %70 : vector<32x128xf32>
    %72 = vector.extract_strided_slice %51 {offsets = [0, 11], sizes = [12, 128], strides = [1, 1]} : vector<12x256xbf16> to vector<12x128xbf16>
    %c13 = arith.constant 13 : index
    %c0_48 = arith.constant 0 : index
    %c0_49 = arith.constant 0 : index
    %73 = vector.load %arg2[%c13, %c0_48, %c0_49] : memref<27x32x12xbf16, #tpu.memory_space<vmem>>, vector<1x32x12xbf16>
    %74 = vector.shape_cast %73 : vector<1x32x12xbf16> to vector<32x12xbf16>
    %cst_50 = arith.constant dense<0.000000e+00> : vector<32x128xf32>
    %75 = tpu.matmul %74, %72, %cst_50 {dimension_numbers = #tpu.dot_dimension_numbers<[1], [0], [0], [1], [0, 0, 1, 1], [], []>} : vector<32x12xbf16>, vector<12x128xbf16>, vector<32x128xf32> -> vector<32x128xf32>
    %76 = arith.addf %71, %75 : vector<32x128xf32>
    %77 = vector.extract_strided_slice %51 {offsets = [0, 12], sizes = [12, 128], strides = [1, 1]} : vector<12x256xbf16> to vector<12x128xbf16>
    %c14 = arith.constant 14 : index
    %c0_51 = arith.constant 0 : index
    %c0_52 = arith.constant 0 : index
    %78 = vector.load %arg2[%c14, %c0_51, %c0_52] : memref<27x32x12xbf16, #tpu.memory_space<vmem>>, vector<1x32x12xbf16>
    %79 = vector.shape_cast %78 : vector<1x32x12xbf16> to vector<32x12xbf16>
    %cst_53 = arith.constant dense<0.000000e+00> : vector<32x128xf32>
    %80 = tpu.matmul %79, %77, %cst_53 {dimension_numbers = #tpu.dot_dimension_numbers<[1], [0], [0], [1], [0, 0, 1, 1], [], []>} : vector<32x12xbf16>, vector<12x128xbf16>, vector<32x128xf32> -> vector<32x128xf32>
    %81 = arith.addf %76, %80 : vector<32x128xf32>
    %82 = vector.extract_strided_slice %51 {offsets = [0, 20], sizes = [12, 128], strides = [1, 1]} : vector<12x256xbf16> to vector<12x128xbf16>
    %c15 = arith.constant 15 : index
    %c0_54 = arith.constant 0 : index
    %c0_55 = arith.constant 0 : index
    %83 = vector.load %arg2[%c15, %c0_54, %c0_55] : memref<27x32x12xbf16, #tpu.memory_space<vmem>>, vector<1x32x12xbf16>
    %84 = vector.shape_cast %83 : vector<1x32x12xbf16> to vector<32x12xbf16>
    %cst_56 = arith.constant dense<0.000000e+00> : vector<32x128xf32>
    %85 = tpu.matmul %84, %82, %cst_56 {dimension_numbers = #tpu.dot_dimension_numbers<[1], [0], [0], [1], [0, 0, 1, 1], [], []>} : vector<32x12xbf16>, vector<12x128xbf16>, vector<32x128xf32> -> vector<32x128xf32>
    %86 = arith.addf %81, %85 : vector<32x128xf32>
    %87 = vector.extract_strided_slice %51 {offsets = [0, 21], sizes = [12, 128], strides = [1, 1]} : vector<12x256xbf16> to vector<12x128xbf16>
    %c16 = arith.constant 16 : index
    %c0_57 = arith.constant 0 : index
    %c0_58 = arith.constant 0 : index
    %88 = vector.load %arg2[%c16, %c0_57, %c0_58] : memref<27x32x12xbf16, #tpu.memory_space<vmem>>, vector<1x32x12xbf16>
    %89 = vector.shape_cast %88 : vector<1x32x12xbf16> to vector<32x12xbf16>
    %cst_59 = arith.constant dense<0.000000e+00> : vector<32x128xf32>
    %90 = tpu.matmul %89, %87, %cst_59 {dimension_numbers = #tpu.dot_dimension_numbers<[1], [0], [0], [1], [0, 0, 1, 1], [], []>} : vector<32x12xbf16>, vector<12x128xbf16>, vector<32x128xf32> -> vector<32x128xf32>
    %91 = arith.addf %86, %90 : vector<32x128xf32>
    %92 = vector.extract_strided_slice %51 {offsets = [0, 22], sizes = [12, 128], strides = [1, 1]} : vector<12x256xbf16> to vector<12x128xbf16>
    %c17 = arith.constant 17 : index
    %c0_60 = arith.constant 0 : index
    %c0_61 = arith.constant 0 : index
    %93 = vector.load %arg2[%c17, %c0_60, %c0_61] : memref<27x32x12xbf16, #tpu.memory_space<vmem>>, vector<1x32x12xbf16>
    %94 = vector.shape_cast %93 : vector<1x32x12xbf16> to vector<32x12xbf16>
    %cst_62 = arith.constant dense<0.000000e+00> : vector<32x128xf32>
    %95 = tpu.matmul %94, %92, %cst_62 {dimension_numbers = #tpu.dot_dimension_numbers<[1], [0], [0], [1], [0, 0, 1, 1], [], []>} : vector<32x12xbf16>, vector<12x128xbf16>, vector<32x128xf32> -> vector<32x128xf32>
    %96 = arith.addf %91, %95 : vector<32x128xf32>
    %c0_63 = arith.constant 0 : index
    %c0_64 = arith.constant 0 : index
    %c0_65 = arith.constant 0 : index
    %c0_66 = arith.constant 0 : index
    %97 = vector.load %arg6[%c0_63, %c0_64, %c0_65, %c0_66] : memref<1x1x12x256xbf16, #tpu.memory_space<vmem>>, vector<1x1x12x256xbf16>
    %98 = vector.shape_cast %97 : vector<1x1x12x256xbf16> to vector<12x256xbf16>
    %99 = vector.extract_strided_slice %98 {offsets = [0, 0], sizes = [12, 128], strides = [1, 1]} : vector<12x256xbf16> to vector<12x128xbf16>
    %c18 = arith.constant 18 : index
    %c0_67 = arith.constant 0 : index
    %c0_68 = arith.constant 0 : index
    %100 = vector.load %arg2[%c18, %c0_67, %c0_68] : memref<27x32x12xbf16, #tpu.memory_space<vmem>>, vector<1x32x12xbf16>
    %101 = vector.shape_cast %100 : vector<1x32x12xbf16> to vector<32x12xbf16>
    %cst_69 = arith.constant dense<0.000000e+00> : vector<32x128xf32>
    %102 = tpu.matmul %101, %99, %cst_69 {dimension_numbers = #tpu.dot_dimension_numbers<[1], [0], [0], [1], [0, 0, 1, 1], [], []>} : vector<32x12xbf16>, vector<12x128xbf16>, vector<32x128xf32> -> vector<32x128xf32>
    %103 = arith.addf %96, %102 : vector<32x128xf32>
    %104 = vector.extract_strided_slice %98 {offsets = [0, 1], sizes = [12, 128], strides = [1, 1]} : vector<12x256xbf16> to vector<12x128xbf16>
    %c19 = arith.constant 19 : index
    %c0_70 = arith.constant 0 : index
    %c0_71 = arith.constant 0 : index
    %105 = vector.load %arg2[%c19, %c0_70, %c0_71] : memref<27x32x12xbf16, #tpu.memory_space<vmem>>, vector<1x32x12xbf16>
    %106 = vector.shape_cast %105 : vector<1x32x12xbf16> to vector<32x12xbf16>
    %cst_72 = arith.constant dense<0.000000e+00> : vector<32x128xf32>
    %107 = tpu.matmul %106, %104, %cst_72 {dimension_numbers = #tpu.dot_dimension_numbers<[1], [0], [0], [1], [0, 0, 1, 1], [], []>} : vector<32x12xbf16>, vector<12x128xbf16>, vector<32x128xf32> -> vector<32x128xf32>
    %108 = arith.addf %103, %107 : vector<32x128xf32>
    %109 = vector.extract_strided_slice %98 {offsets = [0, 2], sizes = [12, 128], strides = [1, 1]} : vector<12x256xbf16> to vector<12x128xbf16>
    %c20 = arith.constant 20 : index
    %c0_73 = arith.constant 0 : index
    %c0_74 = arith.constant 0 : index
    %110 = vector.load %arg2[%c20, %c0_73, %c0_74] : memref<27x32x12xbf16, #tpu.memory_space<vmem>>, vector<1x32x12xbf16>
    %111 = vector.shape_cast %110 : vector<1x32x12xbf16> to vector<32x12xbf16>
    %cst_75 = arith.constant dense<0.000000e+00> : vector<32x128xf32>
    %112 = tpu.matmul %111, %109, %cst_75 {dimension_numbers = #tpu.dot_dimension_numbers<[1], [0], [0], [1], [0, 0, 1, 1], [], []>} : vector<32x12xbf16>, vector<12x128xbf16>, vector<32x128xf32> -> vector<32x128xf32>
    %113 = arith.addf %108, %112 : vector<32x128xf32>
    %114 = vector.extract_strided_slice %98 {offsets = [0, 10], sizes = [12, 128], strides = [1, 1]} : vector<12x256xbf16> to vector<12x128xbf16>
    %c21 = arith.constant 21 : index
    %c0_76 = arith.constant 0 : index
    %c0_77 = arith.constant 0 : index
    %115 = vector.load %arg2[%c21, %c0_76, %c0_77] : memref<27x32x12xbf16, #tpu.memory_space<vmem>>, vector<1x32x12xbf16>
    %116 = vector.shape_cast %115 : vector<1x32x12xbf16> to vector<32x12xbf16>
    %cst_78 = arith.constant dense<0.000000e+00> : vector<32x128xf32>
    %117 = tpu.matmul %116, %114, %cst_78 {dimension_numbers = #tpu.dot_dimension_numbers<[1], [0], [0], [1], [0, 0, 1, 1], [], []>} : vector<32x12xbf16>, vector<12x128xbf16>, vector<32x128xf32> -> vector<32x128xf32>
    %118 = arith.addf %113, %117 : vector<32x128xf32>
    %119 = vector.extract_strided_slice %98 {offsets = [0, 11], sizes = [12, 128], strides = [1, 1]} : vector<12x256xbf16> to vector<12x128xbf16>
    %c22 = arith.constant 22 : index
    %c0_79 = arith.constant 0 : index
    %c0_80 = arith.constant 0 : index
    %120 = vector.load %arg2[%c22, %c0_79, %c0_80] : memref<27x32x12xbf16, #tpu.memory_space<vmem>>, vector<1x32x12xbf16>
    %121 = vector.shape_cast %120 : vector<1x32x12xbf16> to vector<32x12xbf16>
    %cst_81 = arith.constant dense<0.000000e+00> : vector<32x128xf32>
    %122 = tpu.matmul %121, %119, %cst_81 {dimension_numbers = #tpu.dot_dimension_numbers<[1], [0], [0], [1], [0, 0, 1, 1], [], []>} : vector<32x12xbf16>, vector<12x128xbf16>, vector<32x128xf32> -> vector<32x128xf32>
    %123 = arith.addf %118, %122 : vector<32x128xf32>
    %124 = vector.extract_strided_slice %98 {offsets = [0, 12], sizes = [12, 128], strides = [1, 1]} : vector<12x256xbf16> to vector<12x128xbf16>
    %c23 = arith.constant 23 : index
    %c0_82 = arith.constant 0 : index
    %c0_83 = arith.constant 0 : index
    %125 = vector.load %arg2[%c23, %c0_82, %c0_83] : memref<27x32x12xbf16, #tpu.memory_space<vmem>>, vector<1x32x12xbf16>
    %126 = vector.shape_cast %125 : vector<1x32x12xbf16> to vector<32x12xbf16>
    %cst_84 = arith.constant dense<0.000000e+00> : vector<32x128xf32>
    %127 = tpu.matmul %126, %124, %cst_84 {dimension_numbers = #tpu.dot_dimension_numbers<[1], [0], [0], [1], [0, 0, 1, 1], [], []>} : vector<32x12xbf16>, vector<12x128xbf16>, vector<32x128xf32> -> vector<32x128xf32>
    %128 = arith.addf %123, %127 : vector<32x128xf32>
    %129 = vector.extract_strided_slice %98 {offsets = [0, 20], sizes = [12, 128], strides = [1, 1]} : vector<12x256xbf16> to vector<12x128xbf16>
    %c24 = arith.constant 24 : index
    %c0_85 = arith.constant 0 : index
    %c0_86 = arith.constant 0 : index
    %130 = vector.load %arg2[%c24, %c0_85, %c0_86] : memref<27x32x12xbf16, #tpu.memory_space<vmem>>, vector<1x32x12xbf16>
    %131 = vector.shape_cast %130 : vector<1x32x12xbf16> to vector<32x12xbf16>
    %cst_87 = arith.constant dense<0.000000e+00> : vector<32x128xf32>
    %132 = tpu.matmul %131, %129, %cst_87 {dimension_numbers = #tpu.dot_dimension_numbers<[1], [0], [0], [1], [0, 0, 1, 1], [], []>} : vector<32x12xbf16>, vector<12x128xbf16>, vector<32x128xf32> -> vector<32x128xf32>
    %133 = arith.addf %128, %132 : vector<32x128xf32>
    %134 = vector.extract_strided_slice %98 {offsets = [0, 21], sizes = [12, 128], strides = [1, 1]} : vector<12x256xbf16> to vector<12x128xbf16>
    %c25 = arith.constant 25 : index
    %c0_88 = arith.constant 0 : index
    %c0_89 = arith.constant 0 : index
    %135 = vector.load %arg2[%c25, %c0_88, %c0_89] : memref<27x32x12xbf16, #tpu.memory_space<vmem>>, vector<1x32x12xbf16>
    %136 = vector.shape_cast %135 : vector<1x32x12xbf16> to vector<32x12xbf16>
    %cst_90 = arith.constant dense<0.000000e+00> : vector<32x128xf32>
    %137 = tpu.matmul %136, %134, %cst_90 {dimension_numbers = #tpu.dot_dimension_numbers<[1], [0], [0], [1], [0, 0, 1, 1], [], []>} : vector<32x12xbf16>, vector<12x128xbf16>, vector<32x128xf32> -> vector<32x128xf32>
    %138 = arith.addf %133, %137 : vector<32x128xf32>
    %139 = vector.extract_strided_slice %98 {offsets = [0, 22], sizes = [12, 128], strides = [1, 1]} : vector<12x256xbf16> to vector<12x128xbf16>
    %c26 = arith.constant 26 : index
    %c0_91 = arith.constant 0 : index
    %c0_92 = arith.constant 0 : index
    %140 = vector.load %arg2[%c26, %c0_91, %c0_92] : memref<27x32x12xbf16, #tpu.memory_space<vmem>>, vector<1x32x12xbf16>
    %141 = vector.shape_cast %140 : vector<1x32x12xbf16> to vector<32x12xbf16>
    %cst_93 = arith.constant dense<0.000000e+00> : vector<32x128xf32>
    %142 = tpu.matmul %141, %139, %cst_93 {dimension_numbers = #tpu.dot_dimension_numbers<[1], [0], [0], [1], [0, 0, 1, 1], [], []>} : vector<32x12xbf16>, vector<12x128xbf16>, vector<32x128xf32> -> vector<32x128xf32>
    %143 = arith.addf %138, %142 : vector<32x128xf32>
    %144 = vector.extract_strided_slice %143 {offsets = [0, 0], sizes = [8, 128], strides = [1, 1]} : vector<32x128xf32> to vector<8x128xf32>
    %cst_94 = arith.constant 5.000000e-01 : f32
    %145 = vector.broadcast %cst_94 : f32 to vector<8x128xf32>
    %146 = arith.mulf %145, %144 : vector<8x128xf32>
    %147 = math.tanh %146 : vector<8x128xf32>
    %cst_95 = arith.constant 5.000000e-01 : f32
    %148 = vector.broadcast %cst_95 : f32 to vector<8x128xf32>
    %149 = arith.mulf %148, %147 : vector<8x128xf32>
    %cst_96 = arith.constant 5.000000e-01 : f32
    %150 = vector.broadcast %cst_96 : f32 to vector<8x128xf32>
    %151 = arith.addf %149, %150 : vector<8x128xf32>
    %152 = vector.extract_strided_slice %143 {offsets = [8, 0], sizes = [8, 128], strides = [1, 1]} : vector<32x128xf32> to vector<8x128xf32>
    %cst_97 = arith.constant 5.000000e-01 : f32
    %153 = vector.broadcast %cst_97 : f32 to vector<8x128xf32>
    %154 = arith.mulf %153, %152 : vector<8x128xf32>
    %155 = math.tanh %154 : vector<8x128xf32>
    %cst_98 = arith.constant 5.000000e-01 : f32
    %156 = vector.broadcast %cst_98 : f32 to vector<8x128xf32>
    %157 = arith.mulf %156, %155 : vector<8x128xf32>
    %cst_99 = arith.constant 5.000000e-01 : f32
    %158 = vector.broadcast %cst_99 : f32 to vector<8x128xf32>
    %159 = arith.addf %157, %158 : vector<8x128xf32>
    %160 = vector.extract_strided_slice %143 {offsets = [16, 0], sizes = [8, 128], strides = [1, 1]} : vector<32x128xf32> to vector<8x128xf32>
    %cst_100 = arith.constant 5.000000e-01 : f32
    %161 = vector.broadcast %cst_100 : f32 to vector<8x128xf32>
    %162 = arith.mulf %161, %160 : vector<8x128xf32>
    %163 = math.tanh %162 : vector<8x128xf32>
    %cst_101 = arith.constant 5.000000e-01 : f32
    %164 = vector.broadcast %cst_101 : f32 to vector<8x128xf32>
    %165 = arith.mulf %164, %163 : vector<8x128xf32>
    %cst_102 = arith.constant 5.000000e-01 : f32
    %166 = vector.broadcast %cst_102 : f32 to vector<8x128xf32>
    %167 = arith.addf %165, %166 : vector<8x128xf32>
    %168 = vector.extract_strided_slice %143 {offsets = [24, 0], sizes = [8, 128], strides = [1, 1]} : vector<32x128xf32> to vector<8x128xf32>
    %169 = math.tanh %168 : vector<8x128xf32>
    %c0_103 = arith.constant 0 : index
    %c0_104 = arith.constant 0 : index
    %c0_105 = arith.constant 0 : index
    %c0_106 = arith.constant 0 : index
    %170 = vector.load %arg7[%c0_103, %c0_104, %c0_105, %c0_106] : memref<1x1x8x128xf32, #tpu.memory_space<vmem>>, vector<1x1x8x128xf32>
    %171 = vector.shape_cast %170 : vector<1x1x8x128xf32> to vector<8x128xf32>
    %172 = arith.mulf %159, %171 : vector<8x128xf32>
    %173 = arith.mulf %151, %169 : vector<8x128xf32>
    %174 = arith.addf %172, %173 : vector<8x128xf32>
    %175 = math.tanh %174 : vector<8x128xf32>
    %176 = arith.mulf %167, %175 : vector<8x128xf32>
    %c0_107 = arith.constant 0 : index
    %c0_108 = arith.constant 0 : index
    %c0_109 = arith.constant 0 : index
    %c0_110 = arith.constant 0 : index
    %177 = vector.load %arg8[%c0_107, %c0_108, %c0_109, %c0_110] : memref<1x1x8x128xf32, #tpu.memory_space<vmem>>, vector<1x1x8x128xf32>
    %178 = vector.shape_cast %177 : vector<1x1x8x128xf32> to vector<8x128xf32>
    %179 = vector.shape_cast %176 : vector<8x128xf32> to vector<1x1x8x128xf32>
    tpu.vector_store %arg8[%c0_107, %c0_108, %c0_109, %c0_110], %179 {strides = array<i32>} : memref<1x1x8x128xf32, #tpu.memory_space<vmem>>, vector<1x1x8x128xf32>,
    %c0_111 = arith.constant 0 : index
    %c0_112 = arith.constant 0 : index
    %c0_113 = arith.constant 0 : index
    %c0_114 = arith.constant 0 : index
    %180 = vector.load %arg9[%c0_111, %c0_112, %c0_113, %c0_114] : memref<1x1x8x128xf32, #tpu.memory_space<vmem>>, vector<1x1x8x128xf32>
    %181 = vector.shape_cast %180 : vector<1x1x8x128xf32> to vector<8x128xf32>
    %182 = vector.shape_cast %174 : vector<8x128xf32> to vector<1x1x8x128xf32>
    tpu.vector_store %arg9[%c0_111, %c0_112, %c0_113, %c0_114], %182 {strides = array<i32>} : memref<1x1x8x128xf32, #tpu.memory_space<vmem>>, vector<1x1x8x128xf32>,
    return
  }
  func.func @transform_0(%arg0: i32, %arg1: i32) -> (i32, i32, i32) {
    %c0_i32 = arith.constant 0 : i32
    %c0_i32_0 = arith.constant 0 : i32
    %c0_i32_1 = arith.constant 0 : i32
    %c0_i32_2 = arith.constant 0 : i32
    return %c0_i32, %c0_i32_0, %c0_i32_1 : i32, i32, i32
  }
  func.func @transform_1(%arg0: i32, %arg1: i32) -> (i32, i32) {
    %c0_i32 = arith.constant 0 : i32
    %c0_i32_0 = arith.constant 0 : i32
    %c0_i32_1 = arith.constant 0 : i32
    return %c0_i32, %c0_i32_0 : i32, i32
  }
  func.func @transform_2(%arg0: i32, %arg1: i32) -> (i32, i32, i32, i32) {
    %c0_i32 = arith.constant 0 : i32
    %0 = arith.addi %arg1, %c0_i32 : i32
    %c0_i32_0 = arith.constant 0 : i32
    %c0_i32_1 = arith.constant 0 : i32
    %c0_i32_2 = arith.constant 0 : i32
    return %arg0, %0, %c0_i32_0, %c0_i32_1 : i32, i32, i32, i32
  }
  func.func @transform_3(%arg0: i32, %arg1: i32) -> (i32, i32, i32, i32) {
    %c1_i32 = arith.constant 1 : i32
    %0 = arith.addi %arg1, %c1_i32 : i32
    %c0_i32 = arith.constant 0 : i32
    %c0_i32_0 = arith.constant 0 : i32
    %c0_i32_1 = arith.constant 0 : i32
    return %arg0, %0, %c0_i32, %c0_i32_0 : i32, i32, i32, i32
  }
  func.func @transform_4(%arg0: i32, %arg1: i32) -> (i32, i32, i32, i32) {
    %c2_i32 = arith.constant 2 : i32
    %0 = arith.addi %arg1, %c2_i32 : i32
    %c0_i32 = arith.constant 0 : i32
    %c0_i32_0 = arith.constant 0 : i32
    %c0_i32_1 = arith.constant 0 : i32
    return %arg0, %0, %c0_i32, %c0_i32_0 : i32, i32, i32, i32
  }
  func.func @transform_5(%arg0: i32, %arg1: i32) -> (i32, i32, i32, i32) {
    %c0_i32 = arith.constant 0 : i32
    %c0_i32_0 = arith.constant 0 : i32
    %c0_i32_1 = arith.constant 0 : i32
    return %arg0, %arg1, %c0_i32, %c0_i32_0 : i32, i32, i32, i32
  }
  func.func @transform_6(%arg0: i32, %arg1: i32) -> (i32, i32, i32, i32) {
    %c0_i32 = arith.constant 0 : i32
    %c0_i32_0 = arith.constant 0 : i32
    %c0_i32_1 = arith.constant 0 : i32
    return %arg0, %arg1, %c0_i32, %c0_i32_0 : i32, i32, i32, i32
  }
  func.func @transform_7(%arg0: i32, %arg1: i32) -> (i32, i32, i32, i32) {
    %c0_i32 = arith.constant 0 : i32
    %c0_i32_0 = arith.constant 0 : i32
    %c0_i32_1 = arith.constant 0 : i32
    return %arg0, %arg1, %c0_i32, %c0_i32_0 : i32, i32, i32, i32
  }
}

</mosaic_0001>

<bundles_post_ra>
// kernel: clstm_cell_3d.1
= control target key start
LH: loop header
LB: loop body
LE: loop exit
PB: predicated region body
PF: predicated region fallthrough
CT: control target
= control target key end

     0   :  { %s3756_s24 = smov 0   ;;  %s3758_s25 = smov 0   ;;  %s4224_s0 = inlined_call_operand.vmem [shape: bf16[27,32,12], index: 0, kind: input, shape index: {}]   ;;  %s4225_s1 = inlined_call_operand.vmem [shape: f32[32,1], index: 1, kind: input, shape index: {}]   ;;  %s4226_s2 = inlined_call_operand.vmem [shape: bf16[2,6,12,256], index: 2, kind: input, shape index: {}, may-alias: {2,3,4}]   ;;  %s4227_s3 = inlined_call_operand.vmem [shape: bf16[2,6,12,256], index: 3, kind: input, shape index: {}, may-alias: {2,3,4}]   ;;  %s4228_s4 = inlined_call_operand.vmem [shape: bf16[2,6,12,256], index: 4, kind: input, shape index: {}, may-alias: {2,3,4}]   ;;  %s4229_s5 = inlined_call_operand.vmem [shape: f32[2,4,8,128], index: 5, kind: input, shape index: {}]   ;;  %s4230_s6 = inlined_call_operand.vmem [shape: f32[2,4,8,128], index: 6, kind: output, shape index: {0}]   ;;  %s4231_s7 = inlined_call_operand.vmem [shape: f32[2,4,8,128], index: 7, kind: output, shape index: {1}]  }
   0x1   :  { %s3760_s26 = smov 0   ;;  %s3762_s27 = smov 0  }
   0x2   :  { %s3764_s28 = smov 0  }
   0x3 LB: > { %s27_s29 = sadd.s32 1, %s3697_s26  ;;  %s30_s30 = sadd.s32 1, %s3701_s27  ;;  %s3705_s28 = sphi %s3764_s28, %s18_s28   ;;  %s3701_s27 = sphi %s3762_s27, %s4235_s27   ;;  %s3697_s26 = sphi %s3760_s26, %s4234_s26   ;;  %s3693_s25 = sphi %s3758_s25, %s4233_s25   ;;  %s3689_s24 = sphi %s3756_s24, %s4232_s24  }
   0x4   : > { %p28_p0 = scmp.ge.s32.totalorder %s27_s29, 4  ;;  %p2931_p1 = scmp.ge.s32.totalorder %s3705_s28, 1 }
   0x5   : > { %p317_p2 = scmp.lt.s32.totalorder %s3705_s28, 9 }
   0x6   : > { %s4237_s29 = smov (%p28_p0, %s27_s29), 0  ;;  %s4239_s30 = smov (!%p28_p0, %s30_s30), %s3701_s27 }
   0x7   : > { %p318_p3 = pnand %p2931_p1, %p317_p2  ;;  %p32_p4 = scmp.ge.s32.totalorder %s4239_s30, 2 }
   0x8   : > { %p392_p5 = scmp.lt.s32.totalorder (!%p318_p3), %s3693_s25, 1  ;;  %s401_s8 = sadd.s32 (!%p318_p3), 1, %s3689_s24  ;;  %v3603_v0 = vld [vmem:[%s4224_s0] sm:$0xff] (!%p318_p3)   ;;  %vm493_vm0 = vcmask (!%p318_p3), 97280   ;;  %v3605_v1 = vld [vmem:[%s4224_s0 + $0xd0] sm:$0xff] (!%p318_p3)   ;;  %vm500_vm1 = vcmask (!%p318_p3), 1045504  }
   0x9   : > { %s4241_s30 = smov (%p32_p4, %s4239_s30), 0  ;;  %321 = sbr.rel (%p318_p3) target bundleno = 555 (0x22b), region = 44 }
   0xa   : > { %p404_p6 = scmp.lt.s32.totalorder (!%p318_p3), %s401_s8, 5  ;;  %3247 = vmatprep.mubr.msk.bf16.mxu1 (!%p318_p3), %vm493_vm0, %v3603_v0  ;;  %p394_p7 = scmp.lt.s32.totalorder (!%p318_p3), %s3689_s24, 5  ;;  %3325 = vmatprep.mubr.msk.bf16.mxu0 (!%p318_p3), %vm493_vm0, %v3605_v1  ;;  %v3604_v7 = vld [vmem:[%s4224_s0 + $0x8] sm:$0xff] (!%p318_p3)   ;;  %v3607_v8 = vld [vmem:[%s4224_s0 + $0x10] sm:$0xff] (!%p318_p3)   ;;  %vm911_vm2 = vcmask (!%p318_p3), 949248   ;;  %vm828_vm3 = vcmask (!%p318_p3), 957440  }
   0xb   : > { %s3707_s21 = smov (!%p318_p3), 116   ;;  %s3708_s22 = smov (!%p318_p3), 117   ;;  %vm579_vm4 = vcmask (!%p318_p3), 1039360   ;;  %v3606_v18 = vld [vmem:[%s4224_s0 + $0xd8] sm:$0xff] (!%p318_p3)   ;;  %v3609_v22 = vld [vmem:[%s4224_s0 + $0xe0] sm:$0xff] (!%p318_p3)   ;;  %vm994_vm5 = vcmask (!%p318_p3), 883712  }
   0xc   : > { %s412_s9 = sadd.s32 (!%p318_p3), 2, %s3689_s24  ;;  %v3608_v25 = vld [vmem:[%s4224_s0 + $0x18] sm:$0xff] (!%p318_p3)   ;;  %v3611_v26 = vld [vmem:[%s4224_s0 + $0x20] sm:$0xff] (!%p318_p3)   ;;  %vm662_vm6 = vcmask (!%p318_p3), 1031168   ;;  %v3610_v34 = vld [vmem:[%s4224_s0 + $0xe8] sm:$0xff] (!%p318_p3)   ;;  %vm1077_vm7 = vcmask (!%p318_p3), 875520  }
   0xd   : > { %p415_p8 = scmp.lt.s32.totalorder (!%p318_p3), %s412_s9, 5  ;;  %v3613_v35 = vld [vmem:[%s4224_s0 + $0xf0] sm:$0xff] (!%p318_p3)   ;;  %v3612_v40 = vld [vmem:[%s4224_s0 + $0x28] sm:$0xff] (!%p318_p3)   ;;  %vm745_vm8 = vcmask (!%p318_p3), 965632   ;;  %v3614_v48 = vld [vmem:[%s4224_s0 + $0xf8] sm:$0xff] (!%p318_p3)   ;;  %vm1160_vm9 = vcmask (!%p318_p3), 867328  }
   0xe   : > { %v3615_v41 = vld [vmem:[%s4224_s0 + $0x30] sm:$0xff] (!%p318_p3)   ;;  %v3617_v49 = vld [vmem:[%s4224_s0 + $0x100] sm:$0xff] (!%p318_p3)   ;;  %v3616_v55 = vld [vmem:[%s4224_s0 + $0x38] sm:$0xff] (!%p318_p3)   ;;  %v3715_v1 = vmov (!%p318_p3), 0   ;;  %p425_p9 = scmp.lt.s32.totalorder (!%p318_p3), %s3689_s24, 3 }
   0xf   : > { %v3619_v56 = vld [vmem:[%s4224_s0 + $0x40] sm:$0xff] (!%p318_p3)   ;;  %v449_v62 = vld [vmem:[%s4225_s1 + $0x8] sm:$0xff] (!%p318_p3)  ;;  %3592 = vset.pattern.permute.xlu0 (!%p318_p3), %v3715_v1  ;;  %3593 = vset.pattern.permute.xlu1 (!%p318_p3), %v3715_v1 }
  0x10   : > { %s4243_s25 = smov (!%p392_p5, %s3693_s25), 1  ;;  %s4245_s8 = smov (!%p404_p6, %s401_s8), 5  ;;  %v448_v61 = vld [vmem:[%s4225_s1] sm:$0xff] }
  0x11   : > { %s3796_s11 = smul.u32 24, %s4243_s25  ;;  %s2934_s14 = sshll.u32 %s4245_s8, 2 }
  0x12   : > { %s395_s20 = scalar_select %p394_p7, %s3689_s24, 5 }
  0x13   : > { %s408_s15 = sadd.s32 %s3796_s11, %s2934_s14  ;;  %s4247_s9 = smov (!%p415_p8, %s412_s9), 5 }
  0x14   : > { %s2935_s16 = sshll.u32 %s408_s15, 2  ;;  %s2932_s23 = sshll.u32 %s395_s20, 2 }
  0x15   : > { %s410_s19 = scalar_lea.vmem %s4227_s3, %s2935_s16  ;;  %s398_s8 = sadd.s32 %s3796_s11, %s2932_s23 }
  0x16   : > { %v3807_v2 = vld [vmem:[%s410_s19] ss:$8 sps:$4 sm:$0x3f]   ;;  %v3814_v3 = vld [vmem:[%s410_s19 + $0x4] ss:$8 sps:$4 sm:$0x3f]  }
  0x17   : > { %1654 = vrot.lane.b32.xlu1 %v3807_v2, %s3707_s21  ;;  %1572 = vrot.lane.b32.xlu0 %v3807_v2, %s3708_s22  ;;  %s2933_s10 = sshll.u32 %s398_s8, 2  ;;  %s3709_s15 = smov 127  }
  0x18   : > { %s400_s14 = scalar_lea.vmem %s4226_s2, %s2933_s10  ;;  %s2936_s16 = sshll.u32 %s4247_s9, 2 }
  0x19   : > { %v3597_v4 = vld [vmem:[%s400_s14 + $0x4] ss:$8 sps:$4 sm:$0x3f]   ;;  %v3599_v5 = vld [vmem:[%s400_s14] ss:$8 sps:$4 sm:$0x3f]   ;;  %s419_s17 = sadd.s32 %s3796_s11, %s2936_s16 }
  0x1a   : > { %v502_v6 = vsel %vm500_vm1, %v3599_v5, 0  ;;  %3515 = vmatprep.subr.msk.bf16.mxu1 %vm500_vm1, %v3599_v5  ;;  %s2937_s20 = sshll.u32 %s419_s17, 2  ;;  %s3710_s9 = smov 108  }
  0x1b   : > { %1656 = vrot.lane.b32.xlu1 %v3814_v3, %s3707_s21  ;;  %1574 = vrot.lane.b32.xlu0 %v3814_v3, %s3708_s22  ;;  %s421_s13 = scalar_lea.vmem %s4228_s4, %s2937_s20  ;;  %s3711_s11 = smov 126  }
  0x1c   : > { %3246 = vmatpush3.bf16.msra.mxu1 %v502_v6  ;;  %s3712_s14 = smov 107   ;;  %s3713_s16 = smov 118   ;;  %v3861_v9 = vld [vmem:[%s421_s13] ss:$8 sps:$4 sm:$0x3f]   ;;  %v451_v6 = vld [vmem:[%s4225_s1 + $0x18] sm:$0xff] }
  0x1d   : > { %s3714_s17 = smov 106   ;;  %v3602_v10 = vld [vmem:[%s421_s13 + $0x4] ss:$8 sps:$4 sm:$0x3f]   ;;  %s4249_s24 = smov (!%p425_p9, %s3689_s24), 3 }
  0x1f   : > { %577 = vrot.lane.b32.xlu1 %v3597_v4, %s3709_s15  ;;  %575 = vrot.lane.b32.xlu0 %v3599_v5, %s3709_s15 }
  0x20   : > { %3248 = vmatmul.mubr.msk.bf16.vlgmr.msra.gmra.mrb[0].mxu1 %vm493_vm0, %v3604_v7 }
  0x21   : > { %3253 = vmatprep.mubr.msk.bf16.mxu1 %vm493_vm0, %v3607_v8  ;;  %v3620_v8 = vld [vmem:[%s4224_s0 + $0x48] sm:$0xff]  }
  0x23   : > { %1738 = vrot.lane.b32.xlu1 %v3814_v3, %s3710_s9  ;;  %1736 = vrot.lane.b32.xlu0 %v3807_v2, %s3710_s9 }
  0x27   : > { %660 = vrot.lane.b32.xlu1 %v3597_v4, %s3711_s11  ;;  %658 = vrot.lane.b32.xlu0 %v3599_v5, %s3711_s11 }
  0x2b   : > { %1820 = vrot.lane.b32.xlu1 %v3814_v3, %s3712_s14  ;;  %1818 = vrot.lane.b32.xlu0 %v3807_v2, %s3712_s14 }
  0x2f   : > { %743 = vrot.lane.b32.xlu1 %v3597_v4, %s3713_s16  ;;  %741 = vrot.lane.b32.xlu0 %v3599_v5, %s3713_s16 }
  0x33   : > { %1902 = vrot.lane.b32.xlu1 %v3814_v3, %s3714_s17  ;;  %1900 = vrot.lane.b32.xlu0 %v3807_v2, %s3714_s17 }
  0x37   : > { %826 = vrot.lane.b32.xlu1 %v3597_v4, %s3708_s22  ;;  %824 = vrot.lane.b32.xlu0 %v3599_v5, %s3708_s22 }
  0x3b   : > { %909 = vrot.lane.b32.xlu1 %v3597_v4, %s3707_s21  ;;  %907 = vrot.lane.b32.xlu0 %v3599_v5, %s3707_s21 }
  0x3f   : > { %2071 = vrot.lane.b32.xlu1 %v3602_v10, %s3709_s15  ;;  %2069 = vrot.lane.b32.xlu0 %v3861_v9, %s3709_s15 }
  0x43   : > { %992 = vrot.lane.b32.xlu1 %v3597_v4, %s3710_s9  ;;  %990 = vrot.lane.b32.xlu0 %v3599_v5, %s3710_s9 }
  0x47   : > { %2153 = vrot.lane.b32.xlu1 %v3602_v10, %s3711_s11  ;;  %2151 = vrot.lane.b32.xlu0 %v3861_v9, %s3711_s11 }
  0x4b   : > { %1075 = vrot.lane.b32.xlu1 %v3597_v4, %s3712_s14  ;;  %1073 = vrot.lane.b32.xlu0 %v3599_v5, %s3712_s14 }
  0x4f   : > { %2235 = vrot.lane.b32.xlu1 %v3602_v10, %s3713_s16  ;;  %2233 = vrot.lane.b32.xlu0 %v3861_v9, %s3713_s16 }
  0x53   : > { %1158 = vrot.lane.b32.xlu1 %v3597_v4, %s3714_s17  ;;  %1156 = vrot.lane.b32.xlu0 %v3599_v5, %s3714_s17  ;;  %v450_v4 = vld [vmem:[%s4225_s1 + $0x10] sm:$0xff] }
  0x54   : > { %v3621_v5 = vld [vmem:[%s4224_s0 + $0x110] sm:$0xff]  }
  0x57   : > { %2317 = vrot.lane.b32.xlu1 %v3602_v10, %s3708_s22  ;;  %2315 = vrot.lane.b32.xlu0 %v3861_v9, %s3708_s22 }
  0x5b   : > { %2399 = vrot.lane.b32.xlu1 %v3602_v10, %s3707_s21  ;;  %2397 = vrot.lane.b32.xlu0 %v3861_v9, %s3707_s21 }
  0x5f   : > { %1328 = vrot.lane.b32.xlu1 %v3814_v3, %s3709_s15  ;;  %1326 = vrot.lane.b32.xlu0 %v3807_v2, %s3709_s15 }
  0x63   : > { %2481 = vrot.lane.b32.xlu1 %v3602_v10, %s3710_s9  ;;  %2479 = vrot.lane.b32.xlu0 %v3861_v9, %s3710_s9 }
  0x67   : > { %1410 = vrot.lane.b32.xlu1 %v3814_v3, %s3711_s11  ;;  %1408 = vrot.lane.b32.xlu0 %v3807_v2, %s3711_s11  ;;  %s2938_s11 = sshll.u32 %s4243_s25, 2 }
  0x6b   : > { %2563 = vrot.lane.b32.xlu1 %v3602_v10, %s3712_s14  ;;  %2561 = vrot.lane.b32.xlu0 %v3861_v9, %s3712_s14  ;;  %s428_s14 = sadd.s32 %s2938_s11, %s4249_s24 }
  0x6f   : > { %1492 = vrot.lane.b32.xlu1 %v3814_v3, %s3713_s16  ;;  %1490 = vrot.lane.b32.xlu0 %v3807_v2, %s3713_s16  ;;  %v3618_v3 = vld [vmem:[%s4224_s0 + $0x108] sm:$0xff]   ;;  %s2939_s16 = sshll.u32 %s428_s14, 3 }
  0x70   : > { %s430_s22 = scalar_lea.vmem %s4229_s5, %s2939_s16  ;;  %s446_s24 = scalar_lea.vmem %s4231_s7, %s2939_s16 }
  0x71   : > { %s438_s20 = scalar_lea.vmem %s4230_s6, %s2939_s16 }
  0x73   : > { %2645 = vrot.lane.b32.xlu1 %v3602_v10, %s3714_s17  ;;  %2643 = vrot.lane.b32.xlu0 %v3861_v9, %s3714_s17 }
  0x77   : > { %454 = vperm.xlu0 %3592, %v448_v61   ;;  %459 = vperm.xlu1 %3593, %v449_v62   ;;  %v3638_v61 = vld [vmem:[%s4224_s0 + $0x158] sm:$0xff]   ;;  %v3641_v62 = vld [vmem:[%s4224_s0 + $0x160] sm:$0xff]  }
  0x7b   : > { %464 = vperm.xlu0 %3592, %v450_v4   ;;  %469 = vperm.xlu1 %3593, %v451_v6   ;;  %v3643_v4 = vld [vmem:[%s4224_s0 + $0xa0] sm:$0xff]  }
  0x89   : > { %v1655_v11 = vpop.permute.xlu1 %1654  ;;  %v1573_v12 = vpop.permute.xlu0 %1572 }
  0x8d   : > { %v1657_v13 = vpop.permute.xlu1 %1656  ;;  %v1575_v14 = vpop.permute.xlu0 %1574 }
  0x8e   : > { %v1658_v15 = vsel %vm911_vm2, %v1655_v11, %v1657_v13  ;;  %v1576_v16 = vsel %vm828_vm3, %v1573_v12, %v1575_v14  ;;  %v3623_v12 = vld [vmem:[%s4224_s0 + $0x50] sm:$0xff]  }
  0x8f   : > { %3528 = vmatprep.subr.msk.bf16.mxu0 %vm500_vm1, %v1576_v16  ;;  %v1584_v17 = vsel %vm500_vm1, %v1576_v16, 0  ;;  %v1666_v19 = vsel %vm500_vm1, %v1658_v15, 0 }
  0x90   : > { %3324 = vmatpush3.bf16.msra.mxu0 %v1584_v17  ;;  %v3622_v17 = vld [vmem:[%s4224_s0 + $0x118] sm:$0xff]  }
  0x91   : > { %3529 = vmatprep.subr.msk.bf16.mxu0 %vm500_vm1, %v1658_v15  ;;  %v578_v20 = vpop.permute.xlu1 %577  ;;  %v576_v21 = vpop.permute.xlu0 %575 }
  0x92   : > { %v580_v23 = vsel %vm579_vm4, %v576_v21, %v578_v20  ;;  %v3624_v21 = vld [vmem:[%s4224_s0 + $0x58] sm:$0xff]  }
  0x93   : > { %v588_v24 = vsel %vm500_vm1, %v580_v23, 0  ;;  %3326 = vmatmul.mubr.msk.bf16.vlgmr.msra.gmra.mrb[0].mxu0 %vm493_vm0, %v3606_v18  ;;  %3516 = vmatprep.subr.msk.bf16.mxu1 %vm500_vm1, %v580_v23  ;;  %v3625_v18 = vld [vmem:[%s4224_s0 + $0x120] sm:$0xff]  }
  0x94   : > { %3252 = vmatpush3.bf16.msra.mxu1 %v588_v24  ;;  %3330 = vmatpush3.bf16.msra.mxu0 %v1666_v19  ;;  %v1996_v19 = vsel %vm500_vm1, %v3861_v9, 0  ;;  %v3627_v24 = vld [vmem:[%s4224_s0 + $0x60] sm:$0xff]  }
  0x95   : > { %v1739_v27 = vpop.permute.xlu1 %1738  ;;  %v1737_v28 = vpop.permute.xlu0 %1736  ;;  %3331 = vmatprep.mubr.msk.bf16.mxu0 %vm493_vm0, %v3609_v22 }
  0x96   : > { %v1740_v29 = vsel %vm994_vm5, %v1737_v28, %v1739_v27  ;;  %v3626_v28 = vld [vmem:[%s4224_s0 + $0x128] sm:$0xff]  }
  0x97   : > { %3254 = vmatmul.mubr.msk.bf16.vlgmr.msra.gmra.mrb[0].mxu1 %vm493_vm0, %v3608_v25  ;;  %3530 = vmatprep.subr.msk.bf16.mxu0 %vm500_vm1, %v1740_v29  ;;  %v1748_v36 = vsel %vm500_vm1, %v1740_v29, 0  ;;  %v3629_v29 = vld [vmem:[%s4224_s0 + $0x130] sm:$0xff]  }
  0x98   : > { %3259 = vmatprep.mubr.msk.bf16.mxu1 %vm493_vm0, %v3611_v26 }
  0x99   : > { %v661_v30 = vpop.permute.xlu1 %660  ;;  %v659_v31 = vpop.permute.xlu0 %658 }
  0x9a   : > { %v663_v32 = vsel %vm662_vm6, %v659_v31, %v661_v30 }
  0x9b   : > { %v671_v33 = vsel %vm500_vm1, %v663_v32, 0  ;;  %3517 = vmatprep.subr.msk.bf16.mxu1 %vm500_vm1, %v663_v32  ;;  %v3628_v32 = vld [vmem:[%s4224_s0 + $0x68] sm:$0xff]  }
  0x9c   : > { %3258 = vmatpush3.bf16.msra.mxu1 %v671_v33 }
  0x9d   : > { %v1821_v37 = vpop.permute.xlu1 %1820  ;;  %v1819_v38 = vpop.permute.xlu0 %1818 }
  0x9e   : > { %v1822_v39 = vsel %vm1077_vm7, %v1819_v38, %v1821_v37  ;;  %v3630_v38 = vld [vmem:[%s4224_s0 + $0x138] sm:$0xff]  }
  0x9f   : > { %3332 = vmatmul.mubr.msk.bf16.vlgmr.msra.gmra.mrb[0].mxu0 %vm493_vm0, %v3610_v34  ;;  %v1830_v50 = vsel %vm500_vm1, %v1822_v39, 0 }
  0xa0   : > { %3336 = vmatpush3.bf16.msra.mxu0 %v1748_v36  ;;  %3337 = vmatprep.mubr.msk.bf16.mxu0 %vm493_vm0, %v3613_v35  ;;  %v3631_v35 = vld [vmem:[%s4224_s0 + $0x70] sm:$0xff]  }
  0xa1   : > { %v744_v42 = vpop.permute.xlu1 %743  ;;  %v742_v43 = vpop.permute.xlu0 %741  ;;  %3531 = vmatprep.subr.msk.bf16.mxu0 %vm500_vm1, %v1822_v39  ;;  %v3633_v39 = vld [vmem:[%s4224_s0 + $0x140] sm:$0xff]  }
  0xa2   : > { %v746_v44 = vsel %vm745_vm8, %v742_v43, %v744_v42  ;;  %v3632_v42 = vld [vmem:[%s4224_s0 + $0x78] sm:$0xff]  }
  0xa3   : > { %3260 = vmatmul.mubr.msk.bf16.vlgmr.msra.gmra.mrb[0].mxu1 %vm493_vm0, %v3612_v40  ;;  %v754_v45 = vsel %vm500_vm1, %v746_v44, 0  ;;  %3518 = vmatprep.subr.msk.bf16.mxu1 %vm500_vm1, %v746_v44 }
  0xa4   : > { %3264 = vmatpush3.bf16.msra.mxu1 %v754_v45  ;;  %3265 = vmatprep.mubr.msk.bf16.mxu1 %vm493_vm0, %v3615_v41  ;;  %v3635_v45 = vld [vmem:[%s4224_s0 + $0x80] sm:$0xff]  }
  0xa5   : > { %v1903_v46 = vpop.permute.xlu1 %1902  ;;  %v1901_v47 = vpop.permute.xlu0 %1900 }
  0xa6   : > { %v1904_v53 = vsel %vm1160_vm9, %v1901_v47, %v1903_v46 }
  0xa7   : > { %v1912_v7 = vsel %vm500_vm1, %v1904_v53, 0 }
  0xa9   : > { %v827_v51 = vpop.permute.xlu1 %826  ;;  %v825_v52 = vpop.permute.xlu0 %824 }
  0xaa   : > { %v829_v54 = vsel %vm828_vm3, %v825_v52, %v827_v51 }
  0xab   : > { %3338 = vmatmul.mubr.msk.bf16.vlgmr.msra.gmra.mrb[0].mxu0 %vm493_vm0, %v3614_v48  ;;  %3519 = vmatprep.subr.msk.bf16.mxu1 %vm500_vm1, %v829_v54  ;;  %v837_v57 = vsel %vm500_vm1, %v829_v54, 0 }
  0xac   : > { %3342 = vmatpush3.bf16.msra.mxu0 %v1830_v50  ;;  %3343 = vmatprep.mubr.msk.bf16.mxu0 %vm493_vm0, %v3617_v49  ;;  %v3634_v49 = vld [vmem:[%s4224_s0 + $0x148] sm:$0xff]   ;;  %v3637_v50 = vld [vmem:[%s4224_s0 + $0x150] sm:$0xff]  }
  0xad   : > { %3532 = vmatprep.subr.msk.bf16.mxu0 %vm500_vm1, %v1904_v53  ;;  %v910_v58 = vpop.permute.xlu1 %909  ;;  %v908_v59 = vpop.permute.xlu0 %907  ;;  %v3636_v53 = vld [vmem:[%s4224_s0 + $0x88] sm:$0xff]  }
  0xae   : > { %v912_v60 = vsel %vm911_vm2, %v908_v59, %v910_v58 }
  0xaf   : > { %3266 = vmatmul.mubr.msk.bf16.vlgmr.msra.gmra.mrb[0].mxu1 %vm493_vm0, %v3616_v55  ;;  %v920_v13 = vsel %vm500_vm1, %v912_v60, 0 }
  0xb0   : > { %3270 = vmatpush3.bf16.msra.mxu1 %v837_v57  ;;  %3271 = vmatprep.mubr.msk.bf16.mxu1 %vm493_vm0, %v3619_v56  ;;  %v3639_v56 = vld [vmem:[%s4224_s0 + $0x90] sm:$0xff]   ;;  %v1253_v57 = vsel %vm500_vm1, %v3807_v2, 0 }
  0xb1   : > { %3520 = vmatprep.subr.msk.bf16.mxu1 %vm500_vm1, %v912_v60  ;;  %v2072_v63 = vpop.permute.xlu1 %2071  ;;  %v2070_v0 = vpop.permute.xlu0 %2069 }
  0xb2   : > { %v2073_v20 = vsel %vm579_vm4, %v2070_v0, %v2072_v63  ;;  %v3640_v0 = vld [vmem:[%s4224_s0 + $0x98] sm:$0xff]  }
  0xb3   : > { %v2081_v30 = vsel %vm500_vm1, %v2073_v20, 0 }
  0xb5   : > { %v993_v10 = vpop.permute.xlu1 %992  ;;  %v991_v11 = vpop.permute.xlu0 %990 }
  0xb6   : > { %v995_v14 = vsel %vm994_vm5, %v991_v11, %v993_v10  ;;  %v3642_v10 = vld [vmem:[%s4224_s0 + $0x168] sm:$0xff]   ;;  %v3645_v11 = vld [vmem:[%s4224_s0 + $0x170] sm:$0xff]  }
  0xb7   : > { %3344 = vmatmul.mubr.msk.bf16.vlgmr.msra.gmra.mrb[0].mxu0 %vm493_vm0, %v3618_v3  ;;  %v1003_v25 = vsel %vm500_vm1, %v995_v14, 0 }
  0xb8   : > { %3348 = vmatpush3.bf16.msra.mxu0 %v1912_v7  ;;  %3349 = vmatprep.mubr.msk.bf16.mxu0 %vm493_vm0, %v3621_v5 }
  0xb9   : > { %3533 = vmatprep.subr.msk.bf16.mxu0 %vm500_vm1, %v3861_v9  ;;  %v2154_v15 = vpop.permute.xlu1 %2153  ;;  %v2152_v16 = vpop.permute.xlu0 %2151 }
  0xba   : > { %v2155_v31 = vsel %vm662_vm6, %v2152_v16, %v2154_v15 }
  0xbb   : > { %3272 = vmatmul.mubr.msk.bf16.vlgmr.msra.gmra.mrb[0].mxu1 %vm493_vm0, %v3620_v8  ;;  %v2163_v40 = vsel %vm500_vm1, %v2155_v31, 0 }
  0xbc   : > { %3276 = vmatpush3.bf16.msra.mxu1 %v920_v13  ;;  %3277 = vmatprep.mubr.msk.bf16.mxu1 %vm493_vm0, %v3623_v12 }
  0xbd   : > { %3521 = vmatprep.subr.msk.bf16.mxu1 %vm500_vm1, %v995_v14  ;;  %v1076_v22 = vpop.permute.xlu1 %1075  ;;  %v1074_v23 = vpop.permute.xlu0 %1073  ;;  %v3644_v14 = vld [vmem:[%s4224_s0 + $0xa8] sm:$0xff]  }
  0xbe   : > { %v1078_v9 = vsel %vm1077_vm7, %v1074_v23, %v1076_v22 }
  0xbf   : > { %v1086_v36 = vsel %vm500_vm1, %v1078_v9, 0 }
  0xc1   : > { %v2236_v26 = vpop.permute.xlu1 %2235  ;;  %v2234_v27 = vpop.permute.xlu0 %2233 }
  0xc2   : > { %v2237_v41 = vsel %vm745_vm8, %v2234_v27, %v2236_v26  ;;  %v3650_v26 = vld [vmem:[%s4224_s0 + $0x188] sm:$0xff]  }
  0xc3   : > { %3350 = vmatmul.mubr.msk.bf16.vlgmr.msra.gmra.mrb[0].mxu0 %vm493_vm0, %v3622_v17  ;;  %v2245_v51 = vsel %vm500_vm1, %v2237_v41, 0  ;;  %v3647_v17 = vld [vmem:[%s4224_s0 + $0xb0] sm:$0xff]  }
  0xc4   : > { %3354 = vmatpush3.bf16.msra.mxu0 %v1996_v19  ;;  %3355 = vmatprep.mubr.msk.bf16.mxu0 %vm493_vm0, %v3625_v18 }
  0xc5   : > { %3534 = vmatprep.subr.msk.bf16.mxu0 %vm500_vm1, %v2073_v20  ;;  %v1159_v33 = vpop.permute.xlu1 %1158  ;;  %v1157_v34 = vpop.permute.xlu0 %1156  ;;  %v3646_v20 = vld [vmem:[%s4224_s0 + $0x178] sm:$0xff]  }
  0xc6   : > { %v1161_v37 = vsel %vm1160_vm9, %v1157_v34, %v1159_v33  ;;  %v3654_v33 = vld [vmem:[%s4224_s0 + $0x198] sm:$0xff]   ;;  %v3655_v34 = vld [vmem:[%s4224_s0 + $0x1a0] sm:$0xff]  }
  0xc7   : > { %3278 = vmatmul.mubr.msk.bf16.vlgmr.msra.gmra.mrb[0].mxu1 %vm493_vm0, %v3624_v21  ;;  %v1169_v46 = vsel %vm500_vm1, %v1161_v37, 0  ;;  %v3649_v21 = vld [vmem:[%s4224_s0 + $0x180] sm:$0xff]  }
  0xc8   : > { %3282 = vmatpush3.bf16.msra.mxu1 %v1003_v25  ;;  %3283 = vmatprep.mubr.msk.bf16.mxu1 %vm493_vm0, %v3627_v24  ;;  %v3648_v24 = vld [vmem:[%s4224_s0 + $0xb8] sm:$0xff]   ;;  %v3651_v25 = vld [vmem:[%s4224_s0 + $0xc0] sm:$0xff]  }
  0xc9   : > { %3522 = vmatprep.subr.msk.bf16.mxu1 %vm500_vm1, %v1078_v9  ;;  %v2318_v43 = vpop.permute.xlu1 %2317  ;;  %v2316_v44 = vpop.permute.xlu0 %2315 }
  0xca   : > { %v2319_v52 = vsel %vm828_vm3, %v2316_v44, %v2318_v43 }
  0xcd   : > { %v2400_v47 = vpop.permute.xlu1 %2399  ;;  %v2398_v48 = vpop.permute.xlu0 %2397 }
  0xce   : > { %v2401_v63 = vsel %vm911_vm2, %v2398_v48, %v2400_v47 }
  0xcf   : > { %3356 = vmatmul.mubr.msk.bf16.vlgmr.msra.gmra.mrb[0].mxu0 %vm493_vm0, %v3626_v28  ;;  %v2409_v12 = vsel %vm500_vm1, %v2401_v63, 0 }
  0xd0   : > { %3360 = vmatpush3.bf16.msra.mxu0 %v2081_v30  ;;  %3361 = vmatprep.mubr.msk.bf16.mxu0 %vm493_vm0, %v3629_v29  ;;  %v3653_v29 = vld [vmem:[%s4224_s0 + $0x190] sm:$0xff]  }
  0xd1   : > { %3535 = vmatprep.subr.msk.bf16.mxu0 %vm500_vm1, %v2155_v31  ;;  %v1329_v54 = vpop.permute.xlu1 %1328  ;;  %v1327_v55 = vpop.permute.xlu0 %1326 }
  0xd2   : > { %v1330_v58 = vsel %vm579_vm4, %v1327_v55, %v1329_v54 }
  0xd3   : > { %3284 = vmatmul.mubr.msk.bf16.vlgmr.msra.gmra.mrb[0].mxu1 %vm493_vm0, %v3628_v32  ;;  %v1338_v5 = vsel %vm500_vm1, %v1330_v58, 0  ;;  %v3652_v32 = vld [vmem:[%s4224_s0 + $0xc8] sm:$0xff]  }
  0xd4   : > { %3288 = vmatpush3.bf16.msra.mxu1 %v1086_v36  ;;  %3289 = vmatprep.mubr.msk.bf16.mxu1 %vm493_vm0, %v3631_v35  ;;  %v3656_v36 = vld [vmem:[%s4224_s0 + $0x1a8] sm:$0xff]  }
  0xd5   : > { %3523 = vmatprep.subr.msk.bf16.mxu1 %vm500_vm1, %v1161_v37  ;;  %v2482_v59 = vpop.permute.xlu1 %2481  ;;  %v2480_v60 = vpop.permute.xlu0 %2479 }
  0xd6   : > { %v2483_v13 = vsel %vm994_vm5, %v2480_v60, %v2482_v59 }
  0xd7   : > { %v2491_v22 = vsel %vm500_vm1, %v2483_v13, 0 }
  0xd9   : > { %v1411_v1 = vpop.permute.xlu1 %1410  ;;  %v1409_v3 = vpop.permute.xlu0 %1408 }
  0xda   : > { %v1412_v6 = vsel %vm662_vm6, %v1409_v3, %v1411_v1  ;;  %v2723_v1 = vld [vmem:[%s430_s22] sm:$0xff] }
  0xdb   : > { %3362 = vmatmul.mubr.msk.bf16.vlgmr.msra.gmra.mrb[0].mxu0 %vm493_vm0, %v3630_v38  ;;  %v1420_v18 = vsel %vm500_vm1, %v1412_v6, 0 }
  0xdc   : > { %3366 = vmatpush3.bf16.msra.mxu0 %v2163_v40  ;;  %3367 = vmatprep.mubr.msk.bf16.mxu0 %vm493_vm0, %v3633_v39 }
  0xdd   : > { %3536 = vmatprep.subr.msk.bf16.mxu0 %vm500_vm1, %v2237_v41  ;;  %v2564_v7 = vpop.permute.xlu1 %2563  ;;  %v2562_v8 = vpop.permute.xlu0 %2561 }
  0xde   : > { %v2565_v23 = vsel %vm1077_vm7, %v2562_v8, %v2564_v7 }
  0xdf   : > { %3290 = vmatmul.mubr.msk.bf16.vlgmr.msra.gmra.mrb[0].mxu1 %vm493_vm0, %v3632_v42  ;;  %v2573_v30 = vsel %vm500_vm1, %v2565_v23, 0 }
  0xe0   : > { %3294 = vmatpush3.bf16.msra.mxu1 %v1169_v46  ;;  %3295 = vmatprep.mubr.msk.bf16.mxu1 %vm493_vm0, %v3635_v45 }
  0xe1   : > { %3524 = vmatprep.subr.msk.bf16.mxu1 %vm500_vm1, %v3807_v2  ;;  %v2327_v2 = vsel %vm500_vm1, %v2319_v52, 0  ;;  %v1493_v15 = vpop.permute.xlu1 %1492  ;;  %v1491_v16 = vpop.permute.xlu0 %1490 }
  0xe2   : > { %v1494_v19 = vsel %vm745_vm8, %v1491_v16, %v1493_v15 }
  0xe3   : > { %v1502_v9 = vsel %vm500_vm1, %v1494_v19, 0 }
  0xe5   : > { %v2646_v27 = vpop.permute.xlu1 %2645  ;;  %v2644_v28 = vpop.permute.xlu0 %2643 }
  0xe6   : > { %v2647_v31 = vsel %vm1160_vm9, %v2644_v28, %v2646_v27 }
  0xe7   : > { %3368 = vmatmul.mubr.msk.bf16.vlgmr.msra.gmra.mrb[0].mxu0 %vm493_vm0, %v3634_v49  ;;  %v2655_v35 = vsel %vm500_vm1, %v2647_v31, 0 }
  0xe8   : > { %3372 = vmatpush3.bf16.msra.mxu0 %v2245_v51  ;;  %3373 = vmatprep.mubr.msk.bf16.mxu0 %vm493_vm0, %v3637_v50 }
  0xe9   : > { %3537 = vmatprep.subr.msk.bf16.mxu0 %vm500_vm1, %v2319_v52 }
  0xeb   : > { %3296 = vmatmul.mubr.msk.bf16.vlgmr.msra.gmra.mrb[0].mxu1 %vm493_vm0, %v3636_v53 }
  0xec   : > { %3300 = vmatpush3.bf16.msra.mxu1 %v1253_v57  ;;  %3301 = vmatprep.mubr.msk.bf16.mxu1 %vm493_vm0, %v3639_v56 }
  0xed   : > { %3525 = vmatprep.subr.msk.bf16.mxu1 %vm500_vm1, %v1330_v58 }
  0xf3   : > { %3374 = vmatmul.mubr.msk.bf16.vlgmr.msra.gmra.mrb[0].mxu0 %vm493_vm0, %v3638_v61 }
  0xf4   : > { %3378 = vmatpush3.bf16.msra.mxu0 %v2327_v2  ;;  %3379 = vmatprep.mubr.msk.bf16.mxu0 %vm493_vm0, %v3641_v62 }
  0xf5   : > { %3538 = vmatprep.subr.msk.bf16.mxu0 %vm500_vm1, %v2401_v63 }
  0xf6   : > { %v455_v41 = vpop.permute.xlu0 %454  ;;  %v460_v42 = vpop.permute.xlu1 %459 }
  0xf7   : > { %3302 = vmatmul.mubr.msk.bf16.vlgmr.msra.gmra.mrb[0].mxu1 %vm493_vm0, %v3640_v0 }
  0xf8   : > { %3306 = vmatpush3.bf16.msra.mxu1 %v1338_v5  ;;  %3307 = vmatprep.mubr.msk.bf16.mxu1 %vm493_vm0, %v3643_v4 }
  0xf9   : > { %3526 = vmatprep.subr.msk.bf16.mxu1 %vm500_vm1, %v1412_v6 }
  0xfa   : > { %v465_v43 = vpop.permute.xlu0 %464  ;;  %v470_v44 = vpop.permute.xlu1 %469 }
  0xff   : > { %3380 = vmatmul.mubr.msk.bf16.vlgmr.msra.gmra.mrb[0].mxu0 %vm493_vm0, %v3642_v10 }
 0x100   : > { %3384 = vmatpush3.bf16.msra.mxu0 %v2409_v12  ;;  %3385 = vmatprep.mubr.msk.bf16.mxu0 %vm493_vm0, %v3645_v11 }
 0x101   : > { %3539 = vmatprep.subr.msk.bf16.mxu0 %vm500_vm1, %v2483_v13 }
 0x103   : > { %3308 = vmatmul.mubr.msk.bf16.vlgmr.msra.gmra.mrb[0].mxu1 %vm493_vm0, %v3644_v14 }
 0x104   : > { %3312 = vmatpush3.bf16.msra.mxu1 %v1420_v18  ;;  %3313 = vmatprep.mubr.msk.bf16.mxu1 %vm493_vm0, %v3647_v17 }
 0x105   : > { %3527 = vmatprep.subr.msk.bf16.mxu1 %vm500_vm1, %v1494_v19 }
 0x10b   : > { %3386 = vmatmul.mubr.msk.bf16.vlgmr.msra.gmra.mrb[0].mxu0 %vm493_vm0, %v3646_v20 }
 0x10c   : > { %3390 = vmatpush3.bf16.msra.mxu0 %v2491_v22  ;;  %3391 = vmatprep.mubr.msk.bf16.mxu0 %vm493_vm0, %v3649_v21 }
 0x10d   : > { %3540 = vmatprep.subr.msk.bf16.mxu0 %vm500_vm1, %v2565_v23 }
 0x10f   : > { %3314 = vmatmul.mubr.msk.bf16.vlgmr.msra.gmra.mrb[0].mxu1 %vm493_vm0, %v3648_v24 }
 0x110   : > { %3318 = vmatpush3.bf16.msra.mxu1 %v1502_v9  ;;  %3319 = vmatprep.mubr.msk.bf16.mxu1 %vm493_vm0, %v3651_v25 }
 0x117   : > { %3392 = vmatmul.mubr.msk.bf16.vlgmr.msra.gmra.mrb[0].mxu0 %vm493_vm0, %v3650_v26 }
 0x118   : > { %3396 = vmatpush3.bf16.msra.mxu0 %v2573_v30  ;;  %3397 = vmatprep.mubr.msk.bf16.mxu0 %vm493_vm0, %v3653_v29 }
 0x119   : > { %3541 = vmatprep.subr.msk.bf16.mxu0 %vm500_vm1, %v2647_v31 }
 0x11b   : > { %3320 = vmatmul.mubr.msk.bf16.vlgmr.msra.gmra.mrb[0].mxu1 %vm493_vm0, %v3652_v32 }
 0x123   : > { %3398 = vmatmul.mubr.msk.bf16.vlgmr.msra.gmra.mrb[0].mxu0 %vm493_vm0, %v3654_v33 }
 0x124   : > { %3402 = vmatpush3.bf16.msra.mxu0 %v2655_v35  ;;  %3403 = vmatprep.mubr.msk.bf16.mxu0 %vm493_vm0, %v3655_v34 }
 0x12f   : > { %3404 = vmatmul.mubr.msk.bf16.vlgmr.msra.gmra.mrb[0].mxu0 %vm493_vm0, %v3656_v36 }
 0x1ee   : > { %v3321_v37 = vpop.f32.mrb[0].mxu1 }
 0x1ef   : > { %v1538_v38 = vpop.f32.mrb[1].mxu1  ;;  %v3407_v45 = vadd.f32 %v3321_v37, %v465_v43 }
 0x1f0   : > { %v3322_v39 = vpop.f32.mrb[2].mxu1  ;;  %v3409_v46 = vadd.f32 %v1538_v38, %v455_v41 }
 0x1f1   : > { %v1541_v40 = vpop.f32.mrb[3].mxu1  ;;  %v3411_v48 = vadd.f32 %v3322_v39, %v470_v44 }
 0x1f2   : > { %v3413_v51 = vadd.f32 %v1541_v40, %v460_v42 }
 0x202   : > { %v3405_v47 = vpop.f32.mrb[0].mxu0 }
 0x203   : > { %v3408_v49 = vadd.f32 %v3407_v45, %v3405_v47  ;;  %v2691_v50 = vpop.f32.mrb[1].mxu0 }
 0x204   : > { %v3410_v52 = vadd.f32 %v3409_v46, %v2691_v50  ;;  %v3406_v53 = vpop.f32.mrb[2].mxu0 }
 0x205   : > { %v3412_v54 = vadd.f32 %v3411_v48, %v3406_v53  ;;  %v2694_v55 = vpop.f32.mrb[3].mxu0  ;;  %v2718_v59 = vmul.f32 0.5, %v3408_v49 }
 0x206   : > { %v2710_v56 = vmul.f32 0.5, %v3410_v52  ;;  %v3414_v57 = vadd.f32 %v3413_v51, %v2694_v55 }
 0x208   : > { %3657 = vtanh.f32 %v2710_v56  ;;  %v2714_v58 = vmul.f32 0.5, %v3414_v57 }
 0x20a   : > { %3659 = vtanh.f32 %v2714_v58 }
 0x20b   : > { %3661 = vtanh.f32 %v3412_v54 }
 0x20c   : > { %3663 = vtanh.f32 %v2718_v59 }
 0x212   : > { %v3658_v60 = vpop.eup %3657 }
 0x213   : > { %v2712_v61 = vmul.f32 0.5, %v3658_v60 }
 0x214   : > { %v3660_v62 = vpop.eup %3659 }
 0x215   : > { %v2713_v2 = vadd.f32 0.5, %v2712_v61  ;;  %v2716_v63 = vmul.f32 0.5, %v3660_v62  ;;  %v3662_v0 = vpop.eup %3661 }
 0x216   : > { %v3664_v7 = vpop.eup %3663 }
 0x217   : > { %v2717_v3 = vadd.f32 0.5, %v2716_v63  ;;  %v2725_v4 = vmul.f32 %v3662_v0, %v2713_v2  ;;  %v2720_v8 = vmul.f32 0.5, %v3664_v7 }
 0x219   : > { %v2724_v5 = vmul.f32 %v2723_v1, %v2717_v3  ;;  %v2721_v10 = vadd.f32 0.5, %v2720_v8 }
 0x21b   : > { %v2726_v6 = vadd.f32 %v2725_v4, %v2724_v5 }
 0x21d   : > { %3665 = vtanh.f32 %v2726_v6  ;;  %2730 = vst [vmem:[%s446_s24] sm:$0xff] %v2726_v6 }
 0x227   : > { %v3666_v11 = vpop.eup %3665 }
 0x228   : > { %v2728_v12 = vmul.f32 %v3666_v11, %v2721_v10 }
 0x22a   : > { %2729 = vst [vmem:[%s438_s20] sm:$0xff] %v2728_v12 }
 0x22b PF: > { %s18_s28 = sadd.s32 1, %s3705_s28   ;;  %s4232_s24 = smov %s3697_s26 }
 0x22c   : > { %p15_p10 = scmp.ge.s32.totalorder %s18_s28, 10   ;;  %s4233_s25 = smov %s3701_s27 }
 0x22d   : > { %s4234_s26 = smov %s4237_s29  ;;  %s4235_s27 = smov %s4241_s30 }
 0x22e   :  { %17 = sbr.rel (!%p15_p10) target bundleno = 3 (0x3), region = 121 }

</bundles_post_ra>
